<compile_context>
chip_gen: v6e
topology: v6e:2x2x1
jax: 0.10.0
libtpu: 0.0.40
codegen_flags: <defaults>
</compile_context>

<pallas_src>
import jax
import jax.numpy as jnp
from jax.experimental import pallas as pl
from jax.experimental.pallas import tpu as pltpu


_EPS = 1e-05
_TILE_BYTES_BUDGET = 8 * 1024 * 1024    # one (c_tile, hw_tile) tile
_VMEM_LIMIT_BYTES = 48 * 1024 * 1024    # >= double-buffered (in + out) tiles
_MIN_PARALLEL_STEPS = 4                 # >= 2x TensorCores on v7x


def _frozen_bn_kernel(x_ref, params_ref, o_ref):
    # x_ref:      (c_tile, hw_tile) slab of one image (NCHW view).
    # params_ref: (2, c_tile, 1) float32; row 0 = scale, row 1 = shift,
    #             broadcast along the lane (spatial) axis.
    scale = params_ref[0]
    shift = params_ref[1]
    x = x_ref[...].astype(jnp.float32)
    o_ref[...] = (x * scale + shift).astype(o_ref.dtype)


def frozen_batch_norm_2d(x, weight, bias, running_mean, running_var):
    """FrozenBatchNorm2d forward.  x: (N, C, H, W); params: (C,) each."""
    N, C, H, W = x.shape
    HW = H * W
    itemsize = jnp.dtype(x.dtype).itemsize

    # Fold the frozen stats into a single per-channel affine transform once,
    # outside the kernel, kept in float32 (matches the PyTorch forward, which
    # computes the folded params in the fp32 buffer dtype).
    scale = weight.astype(jnp.float32) * jax.lax.rsqrt(
        running_var.astype(jnp.float32) + _EPS)
    shift = bias.astype(jnp.float32) - running_mean.astype(jnp.float32) * scale
    params = jnp.stack([scale, shift]).reshape(2, C, 1)

    # Free view of the contiguous NCHW data — no transpose, no extra HBM pass.
    x3 = x.reshape(N, C, HW)

    # ---- tile selection -----------------------------------------------------
    budget_elems = max(1, _TILE_BYTES_BUDGET // itemsize)
    c_unit = max(8, 32 // itemsize)      # dtype-aware sublane packing unit
    c_min = min(C, c_unit)               # smallest legal channel tile height

    # Lane axis first: one fully contiguous (c, HW) slab per tile when it fits
    # the budget; otherwise tile spatial in multiples of 128 (cdiv grid +
    # masked ragged tail keeps every non-edge store unmasked and lane-dense).
    if c_min * HW <= budget_elems or HW <= 128:
        hw_tile = HW                     # full dim: always a legal block size
    else:
        hw_tile = max(128, (budget_elems // c_min) // 128 * 128)

    # Then grow channels up to the budget (cdiv grid masks the ragged tail).
    max_c = max(1, budget_elems // hw_tile)
    if C <= max_c:
        c_tile = C                       # full dim: always legal
    else:
        c_tile = max(c_unit, (max_c // c_unit) * c_unit)

    c_blocks = pl.cdiv(C, c_tile)
    hw_blocks = pl.cdiv(HW, hw_tile)

    # Keep enough parallel grid steps for multi-TensorCore chips (v7x: 2 TCs):
    # if everything collapsed into fewer than 4 steps, split the spatial axis.
    if (N * c_blocks * hw_blocks < _MIN_PARALLEL_STEPS
            and hw_tile == HW and HW >= 256):
        want = pl.cdiv(_MIN_PARALLEL_STEPS, N * c_blocks)
        hw_tile = max(128, ((pl.cdiv(HW, want) + 127) // 128) * 128)
        hw_blocks = pl.cdiv(HW, hw_tile)

    grid = (N, c_blocks, hw_blocks)
    data_spec = pl.BlockSpec((None, c_tile, hw_tile),
                             lambda n, ci, hi: (n, ci, hi))
    param_spec = pl.BlockSpec((2, c_tile, 1), lambda n, ci, hi: (0, ci, 0))

    # TODO(synk): PyTorch promotes half-precision inputs to fp32 output when
    # the buffers are fp32; here the output follows x.dtype (the affine math
    # is still performed in fp32 inside the kernel).
    out3 = pl.pallas_call(
        _frozen_bn_kernel,
        out_shape=jax.ShapeDtypeStruct((N, C, HW), x.dtype),
        grid_spec=pltpu.PrefetchScalarGridSpec(
            num_scalar_prefetch=0,
            grid=grid,
            in_specs=[data_spec, param_spec],
            out_specs=data_spec,
        ),
        compiler_params=pltpu.CompilerParams(
            # Pure elementwise op: every grid axis is independent -> shard all
            # of them across TensorCores (matters on v7x: 2 TCs/chip).
            dimension_semantics=("parallel", "parallel", "parallel"),
            vmem_limit_bytes=_VMEM_LIMIT_BYTES,
        ),
    )(x3, params)

    return out3.reshape(N, C, H, W)


if __name__ == "__main__":
    key = jax.random.PRNGKey(0)
    N, C, H, W = 2, 4, 16, 16
    kx, kw, kb, km, kv = jax.random.split(key, 5)

    x = jax.random.normal(kx, (N, C, H, W), dtype=jnp.float32)
    # Deterministic synthetic "frozen" parameters (module init: ones/zeros,
    # perturbed here so the affine transform is non-trivial).
    weight = jnp.ones((C,), jnp.float32) + 0.1 * jax.random.normal(kw, (C,))
    bias = 0.1 * jax.random.normal(kb, (C,))
    running_mean = 0.1 * jax.random.normal(km, (C,))
    running_var = jnp.ones((C,), jnp.float32) + 0.1 * jnp.abs(
        jax.random.normal(kv, (C,)))

    out = frozen_batch_norm_2d(x, weight, bias, running_mean, running_var)
    out = jax.block_until_ready(out)

    # Pure-JAX reference (mirrors the PyTorch forward exactly).
    eps = 1e-05
    ref_scale = (weight * jax.lax.rsqrt(running_var + eps)).reshape(1, C, 1, 1)
    ref = x * ref_scale + (bias.reshape(1, C, 1, 1)
                           - running_mean.reshape(1, C, 1, 1) * ref_scale)

    assert out.shape == (N, C, H, W) and out.dtype == x.dtype
    assert jnp.allclose(out, ref, atol=1e-5, rtol=1e-5)
    print("KERNEL_OK")
</pallas_src>

<mosaic_0001>
module attributes {stable_mosaic.version = 11 : i64} {
  func.func @_frozen_bn_kernel(%arg0: i32, %arg1: i32, %arg2: i32, %arg3: memref<1x4x128xf32, #tpu.memory_space<vmem>>, %arg4: memref<2x4x1xf32, #tpu.memory_space<vmem>>, %arg5: memref<1x4x128xf32, #tpu.memory_space<vmem>>) attributes {dimension_semantics = [#tpu.dimension_semantics<parallel>, #tpu.dimension_semantics<parallel>, #tpu.dimension_semantics<parallel>], iteration_bounds = array<i64: 2, 1, 2>, scalar_prefetch = 0 : i64, scratch_operands = 0 : i64, tpu.core_type = #tpu.core_type<tc>, window_params = [{transform_indices = @transform_0, window_bounds = array<i64: 1, 4, 128>}, {transform_indices = @transform_1, window_bounds = array<i64: 2, 4, 1>}, {transform_indices = @transform_2, window_bounds = array<i64: 1, 4, 128>}]} {
    %c0 = arith.constant 0 : index
    %c0_0 = arith.constant 0 : index
    %c0_1 = arith.constant 0 : index
    %0 = vector.load %arg4[%c0, %c0_0, %c0_1] : memref<2x4x1xf32, #tpu.memory_space<vmem>>, vector<1x4x1xf32>
    %1 = vector.shape_cast %0 : vector<1x4x1xf32> to vector<4x1xf32>
    %c1 = arith.constant 1 : index
    %c0_2 = arith.constant 0 : index
    %c0_3 = arith.constant 0 : index
    %2 = vector.load %arg4[%c1, %c0_2, %c0_3] : memref<2x4x1xf32, #tpu.memory_space<vmem>>, vector<1x4x1xf32>
    %3 = vector.shape_cast %2 : vector<1x4x1xf32> to vector<4x1xf32>
    %c0_4 = arith.constant 0 : index
    %c0_5 = arith.constant 0 : index
    %c0_6 = arith.constant 0 : index
    %4 = vector.load %arg3[%c0_4, %c0_5, %c0_6] : memref<1x4x128xf32, #tpu.memory_space<vmem>>, vector<1x4x128xf32>
    %5 = vector.shape_cast %4 : vector<1x4x128xf32> to vector<4x128xf32>
    %6 = vector.broadcast %1 : vector<4x1xf32> to vector<4x128xf32>
    %7 = arith.mulf %5, %6 : vector<4x128xf32>
    %8 = vector.broadcast %3 : vector<4x1xf32> to vector<4x128xf32>
    %9 = arith.addf %7, %8 : vector<4x128xf32>
    %c0_7 = arith.constant 0 : index
    %c0_8 = arith.constant 0 : index
    %c0_9 = arith.constant 0 : index
    %10 = vector.load %arg5[%c0_7, %c0_8, %c0_9] : memref<1x4x128xf32, #tpu.memory_space<vmem>>, vector<1x4x128xf32>
    %11 = vector.shape_cast %10 : vector<1x4x128xf32> to vector<4x128xf32>
    %12 = vector.shape_cast %9 : vector<4x128xf32> to vector<1x4x128xf32>
    tpu.vector_store %arg5[%c0_7, %c0_8, %c0_9], %12 {strides = array<i32>} : memref<1x4x128xf32, #tpu.memory_space<vmem>>, vector<1x4x128xf32>,
    return
  }
  func.func @transform_0(%arg0: i32, %arg1: i32, %arg2: i32) -> (i32, i32, i32) {
    %c0_i32 = arith.constant 0 : i32
    return %arg0, %arg1, %arg2 : i32, i32, i32
  }
  func.func @transform_1(%arg0: i32, %arg1: i32, %arg2: i32) -> (i32, i32, i32) {
    %c0_i32 = arith.constant 0 : i32
    %c0_i32_0 = arith.constant 0 : i32
    %c0_i32_1 = arith.constant 0 : i32
    return %c0_i32, %arg1, %c0_i32_0 : i32, i32, i32
  }
  func.func @transform_2(%arg0: i32, %arg1: i32, %arg2: i32) -> (i32, i32, i32) {
    %c0_i32 = arith.constant 0 : i32
    return %arg0, %arg1, %arg2 : i32, i32, i32
  }
}

</mosaic_0001>

<bundles_post_ra>
// kernel: tpu_custom_call.1
= control target key start
LH: loop header
LB: loop body
LE: loop exit
PB: predicated region body
PF: predicated region fallthrough
CT: control target
= control target key end

     0   :  { %7 = vsyncpa [#allocation3], 0  ;;  %s752_s0 = inlined_call_operand.hbm [shape: f32[2,4,256], index: 0, kind: input, shape index: {}]   ;;  %s753_s1 = inlined_call_operand.vmem [shape: f32[2,4,1], index: 1, kind: input, shape index: {}]   ;;  %s754_s2 = inlined_call_operand.hbm [shape: f32[2,4,256], index: 2, kind: output, shape index: {}]  }
   0x1   :  { %9 = vsyncpa [#allocation3 + $0x1], 0 }
   0x2   :  { %10 = vsyncpa [#allocation4], 0 }
   0x3   :  { %12 = vsyncpa [#allocation4 + $0x1], 0  ;;  %s590_s9 = smov 0   ;;  %s592_s10 = smov 0  }
   0x4   :  { %s594_s11 = smov 0   ;;  %s596_s12 = smov 0  }
   0x5   :  { %s598_s13 = smov 0   ;;  %s600_s14 = smov 0  }
   0x6   :  { %s602_s15 = smov 0   ;;  %s604_s16 = smov 0  }
   0x7 LB: > { %s349_s17 = sadd.s32 4294967295, %s570_s16   ;;  %s350_s18 = sadd.s32 4294967294, %s570_s16   ;;  %s570_s16 = sphi %s604_s16, %s18_s16   ;;  %s566_s15 = sphi %s602_s15, %s767_s15   ;;  %s562_s14 = sphi %s600_s14, %s766_s14   ;;  %s558_s13 = sphi %s598_s13, %s765_s13   ;;  %s554_s12 = sphi %s596_s12, %s764_s12   ;;  %s550_s11 = sphi %s594_s11, %s763_s11   ;;  %s546_s10 = sphi %s592_s10, %s762_s10   ;;  %s542_s9 = sphi %s590_s9, %s761_s9  }
   0x8   : > { %s30_s19 = sadd.s32 1, %s562_s14  ;;  %s37_s20 = sadd.s32 1, %s566_s15 }
   0x9   : > { %p31_p0 = scmp.ge.s32.totalorder %s30_s19, 2  ;;  %s48_s21 = sadd.s32 1, %s550_s11 }
   0xa   : > { %p55_p1 = scmp.ne.s32.totalorder %s550_s11, %s546_s10  ;;  %p56_p2 = scmp.eq.s32.totalorder %s570_s16, 0 }
   0xb   : > { %s769_s19 = smov (%p31_p0, %s30_s19), 0  ;;  %s771_s20 = smov (!%p31_p0, %s37_s20), %s566_s15 }
   0xc   : > { %s44_s22 = ssub.s32 %s562_s14, %s769_s19  ;;  %p643_p3 = por %p56_p2, %p55_p1 }
   0xd   : > { %p39_p4 = scmp.ge.s32.totalorder %s771_s20, 2  ;;  %p61_p5 = scmp.ne.s32.totalorder %s546_s10, %s542_s9 }
   0xe   : > { %p62_p6 = scmp.eq.s32.totalorder %s349_s17, 0  ;;  %p115_p7 = scmp.eq.s32.totalorder %s349_s17, 3 }
   0xf   : > { %s773_s20 = smov (%p39_p4, %s771_s20), 0  ;;  %p121_p10 = scmp.eq.s32.totalorder %s350_s18, 3 }
  0x10   : > { %p651_p8 = por %p62_p6, %p61_p5  ;;  %p655_p9 = por %p115_p7, %p55_p1 }
  0x11   : > { %s41_s26 = ssub.s32 %s566_s15, %s773_s20  ;;  %p661_p12 = por %p121_p10, %p61_p5 }
  0x12   : > { %s45_s27 = sor.u32 %s44_s22, %s41_s26  ;;  %p378_p13 = scmp.lt.s32.totalorder %s570_s16, 4 }
  0x13   : > { %p46_p11 = scmp.eq.s32.totalorder %s45_s27, 0  ;;  %s148_s29 = sand.u32 1, %s550_s11  }
  0x14   : > { %s758_s28 = scalar_select %p661_p12, 1, 0 }
  0x15   : > { %s668_s30 = scalar_select %p46_p11, %s550_s11, %s48_s21  }
  0x16   : > { %s354_s3 = sshll.u32 %s148_s29, 2  ;;  %s355_s4 = sshll.u32 %s566_s15, 1 }
  0x17   : > { %s159_s5 = sadd.s32 %s562_s14, %s355_s4  ;;  %s152_s6 = scalar_lea.vmem [#allocation2], %s354_s3 }
  0x18   : > { %s163_s7 = sshll.u32 %s152_s6, 4  ;;  %s356_s8 = sshll.u32 %s159_s5, 6  ;;  %s164_s7 = int_to_ptr.vmem [resolvable:$true] %s163_s7 }
  0x19   : > { %s161_s22 = scalar_lea.hbm %s752_s0, %s356_s8  ;;  %p677_p0 = pnand %p378_p13, %p643_p3 }
  0x1a   : > { %p357_p1 = scmp.ge.s32.totalorder %s570_s16, 1  ;;  %p168_p2 = scmp.lt.s32.totalorder %s570_s16, 5 }
  0x1b   : > { %s149_s21 = scalar_lea.sflag [#allocation3], %s148_s29  ;;  %p448_p4 = pneg %p677_p0 }
  0x1c   : > { %s459_s27 = scalar_lea.vmem %s164_s7, 64  ;;  %s572_s3 = smov [#allocation2]  }
  0x1d   : > { %p460_p5 = scmp.ne.s32.totalorder %s164_s7, %s459_s27  ;;  %s464_s4 = sshll.u32 %s572_s3, 4  ;;  %s465_s4 = int_to_ptr.vmem [resolvable:$false] %s464_s4 }
  0x1e   : > { %s466_s5 = scalar_lea.vmem %s465_s4, 128  ;;  %p467_p10 = scmp.lt.s32.totalorder %s164_s7, %s465_s4 }
  0x1f   : > { %p462_p6 = pnand %p460_p5, %p448_p4  ;;  %p468_p11 = scmp.lt.s32.totalorder %s466_s5, %s459_s27 }
  0x21   : > { %p463_p7 = pneg %p462_p6  ;;  %p469_p3 = por %p468_p11, %p467_p10 }
  0x23   : > { %p470_p13 = pnand %p469_p3, %p463_p7 }
  0x25   : > { %473 = shalt.err (!%p470_p13)
}
  0x26   : > { %373 = dma.hbm_to_vmem [thread:$0]  (!%p677_p0), %s161_s22, 64, %s164_s7, %s149_s21  }
  0x27   : > { %p169_p12 = pnand %p357_p1, %p168_p2 }
  0x28   : > { %s692_s23 = sand.u32 (!%p169_p12), 1, %s546_s10  }
  0x29   : > { %172 = sbr.rel (%p169_p12) target bundleno = 192 (0xc0), region = 28  ;;  %s358_s29 = sshll.u32 (!%p169_p12), %s692_s23, 2 }
  0x2a   : > { %s175_s6 = scalar_lea.sflag (!%p169_p12), [#allocation3], %s692_s23  ;;  %s178_s8 = scalar_lea.vmem (!%p169_p12), [#allocation2], %s358_s29 }
  0x2e   : > { %533 = dma.done.wait (%p651_p8), %s175_s6, 64  }
  0x2f   : > { %535 = vsyncadd (%p651_p8), %s175_s6, 4294967232  ;;  %v573_v0 = vmov 0   ;;  %v207_v1 = vld [vmem:[%s753_s1] sm:$0xf]  ;;  %v360_v2 = vld [vmem:[%s753_s1 + $0x4] sm:$0xf] }
  0x30   : > { %445 = vset.pattern.permute.xlu0 %v573_v0  ;;  %s362_s26 = sshll.u32 %s558_s13, 1  ;;  %v210_v3 = vld [vmem:[%s178_s8] sm:$0xf]  ;;  %s202_s27 = scalar_lea.vmem [#allocation5], %s358_s29 }
  0x31   : > { %213 = vperm.xlu0 %445, %v207_v1   ;;  %s238_s21 = sadd.s32 %s554_s12, %s362_s26  ;;  %s242_s3 = sshll.u32 %s202_s27, 4  ;;  %s243_s3 = int_to_ptr.vmem [resolvable:$true] %s242_s3 }
  0x32   : > { %s363_s24 = sshll.u32 %s238_s21, 6  ;;  %s225_s7 = scalar_lea.sflag [#allocation4], %s692_s23 }
  0x33   : > { %s240_s6 = scalar_lea.hbm %s754_s2, %s363_s24  ;;  %s474_s17 = scalar_lea.vmem %s243_s3, 64 }
  0x34   : > { %p475_p8 = scmp.ne.s32.totalorder %s243_s3, %s474_s17  ;;  %s574_s12 = smov [#allocation5]  }
  0x35   : > { %219 = vperm.xlu0 %445, %v360_v2   ;;  %s478_s13 = sshll.u32 %s574_s12, 4  ;;  %s479_s13 = int_to_ptr.vmem [resolvable:$false] %s478_s13 }
  0x36   : > { %p476_p12 = pnand %p475_p8, %p655_p9  ;;  %s480_s29 = scalar_lea.vmem %s479_s13, 128 }
  0x37   : > { %p481_p1 = scmp.lt.s32.totalorder %s243_s3, %s479_s13  ;;  %p482_p2 = scmp.lt.s32.totalorder %s480_s29, %s474_s17 }
  0x38   : > { %p477_p0 = pneg %p476_p12 }
  0x39   : > { %p483_p4 = por %p482_p2, %p481_p1 }
  0x3b   : > { %p484_p5 = pnand %p483_p4, %p477_p0 }
  0xac   : > { %v214_v4 = vpop.permute.xlu0 %213 }
  0xad   : > { %v216_v5 = vmul.f32 %v214_v4, %v210_v3 }
  0xb0   : > { %v220_v6 = vpop.permute.xlu0 %219 }
  0xb1   : > { %v222_v7 = vadd.f32 %v220_v6, %v216_v5 }
  0xb3   : > { %223 = vst [vmem:[%s202_s27] sm:$0xf] %v222_v7 }
  0xb4   : > { %487 = shalt.err (!%p484_p5)
}
  0xb5   : > { %s488_s8 = scalar_lea.hbm %s240_s6, 64  ;;  %s492_s22 = scalar_lea.hbm %s754_s2, 256 }
  0xb6   : > { %p489_p6 = scmp.ne.s32.totalorder %s240_s6, %s488_s8  ;;  %p493_p11 = scmp.lt.s32.totalorder %s240_s6, %s754_s2 }
  0xb7   : > { %p494_p3 = scmp.lt.s32.totalorder %s492_s22, %s488_s8 }
  0xb8   : > { %p490_p7 = pnand %p489_p6, %p655_p9 }
  0xb9   : > { %p495_p13 = por %p494_p3, %p493_p11 }
  0xba   : > { %p491_p10 = pneg %p490_p7 }
  0xbc   : > { %p496_p8 = pnand %p495_p13, %p491_p10 }
  0xbe   : > { %499 = shalt.err (!%p496_p8)
}
  0xbf   : > { %368 = dma.vmem_to_hbm [thread:$0]  (%p655_p9), %s243_s3, 64, %s240_s6, %s225_s7  }
  0xc0 PF: > { %p379_p12 = scmp.ge.s32.totalorder %s570_s16, 2  ;;  %s254_s24 = sand.u32 1, %s542_s9  }
  0xc1   : > { %p760_p0 = scmp.ne.s32.totalorder %s758_s28, 0  ;;  %s255_s27 = scalar_lea.sflag [#allocation4], %s254_s24 }
  0xc3   : > { %p375_p1 = pnand %p379_p12, %p760_p0 }
  0xc5   : > { %p376_p2 = pneg %p375_p1 }
  0xc7   : > { %537 = dma.done.wait (%p376_p2), %s255_s27, 64  }
  0xc8   : > { %539 = vsyncadd (%p376_p2), %s255_s27, 4294967232  ;;  %s18_s16 = sadd.s32 1, %s570_s16   ;;  %s761_s9 = smov %s546_s10 }
  0xc9   : > { %p15_p4 = scmp.ge.s32.totalorder %s18_s16, 6   ;;  %s762_s10 = smov %s550_s11 }
  0xca   : > { %s763_s11 = smov %s668_s30  ;;  %s764_s12 = smov %s562_s14 }
  0xcb   : > { %s765_s13 = smov %s566_s15  ;;  %s766_s14 = smov %s769_s19 }
  0xcc   : > { %s767_s15 = smov %s773_s20  ;;  %17 = sbr.rel (!%p15_p4) target bundleno = 7 (0x7), region = 77 }
  0xd1   :  { %260 = vsyncpa [#allocation3], 1 }
  0xd2   :  { %262 = vsyncpa [#allocation3 + $0x1], 1 }
  0xd3   :  { %263 = vsyncpa [#allocation4], 1 }
  0xd4   :  { %265 = vsyncpa [#allocation4 + $0x1], 1 }

</bundles_post_ra>
